<compile_context>
chip_gen: v5e
topology: v5e:2x2
jax: 0.10.0
libtpu: 0.0.40
codegen_flags: <defaults>
</compile_context>

<pallas_src>
import functools

import jax
import jax.numpy as jnp
from jax.experimental import pallas as pl
from jax.experimental.pallas import tpu as pltpu

_LANE = 128          # lane width of a vreg (output/last-dim alignment)
_SUBLANE = 8         # sublane count of a vreg (batch alignment)
_KPAD_ALIGN = 16     # contraction-dim padding (16 also covers bf16 packing)
_MAX_BATCH_BLOCK = 256   # rows per MXU pass (matches v6e/v7x 256-row MXU)


def _round_up(n, m):
    return ((n + m - 1) // m) * m


# ----------------------------- Pallas kernel --------------------------------

def _decoder_layer_kernel(x_ref, w_ref, s_ref, o_ref, h_ref):
    """One (batch_block, layer) grid step of the fused decoder.

    x_ref: (Mb, Kp)     f32       network input (zero-padded), same block every step
    w_ref: (1, Kp, Np)  f32/bf16  this layer's folded weight (x @ W layout)
    s_ref: (1, 1, Np)   f32       this layer's folded shift
    o_ref: (Mb, Np)     f32       head output (written only at the last layer)
    h_ref: (Mb, Np)     f32       VMEM scratch carrying the activation layer-to-layer
    """
    l = pl.program_id(1)
    n_layers = pl.num_programs(1)
    k_pad = w_ref.shape[1]

    w = w_ref[0]                      # (Kp, Np)
    s = s_ref[0]                      # (1, Np)

    def run_layer(h_in):
        # f32 accumulation on the MXU; shift-add / ReLU epilogue in f32.
        y = jnp.dot(h_in.astype(w.dtype), w,
                    preferred_element_type=jnp.float32) + s

        @pl.when(l < n_layers - 1)        # MLPBlock: ReLU, stays on chip
        def _():
            h_ref[...] = jnp.maximum(y, 0.0)

        @pl.when(l == n_layers - 1)       # Linear head: no activation
        def _():
            o_ref[...] = y

    @pl.when(l == 0)
    def _():
        run_layer(x_ref[...])

    @pl.when(l > 0)
    def _():
        run_layer(h_ref[:, :k_pad])


def _fused_pallas_call(x_pad, w_slab, s_slab, *, m_blk):
    bp, kp = x_pad.shape
    n_layers, _, np_ = w_slab.shape
    nb = bp // m_blk
    w_itemsize = jnp.dtype(w_slab.dtype).itemsize

    # VMEM budget: double-buffered streamed operands + resident blocks + scratch.
    vmem_need = (2 * kp * np_ * w_itemsize        # weight double-buffer
                 + 2 * np_ * 4                    # shift double-buffer
                 + 2 * m_blk * kp * 4             # input block buffers
                 + 2 * m_blk * np_ * 4            # output block buffers
                 + m_blk * np_ * 4)               # activation scratch
    vmem_limit = int(min(96 * 1024 * 1024, max(16 * 1024 * 1024, 2 * vmem_need)))

    cost = pl.CostEstimate(
        flops=int(2 * bp * kp * np_ * n_layers),
        transcendentals=0,
        bytes_accessed=int(w_slab.size * w_itemsize + s_slab.size * 4
                           + x_pad.size * 4 + bp * np_ * 4),
    )

    return pl.pallas_call(
        _decoder_layer_kernel,
        out_shape=jax.ShapeDtypeStruct((bp, np_), jnp.float32),
        grid_spec=pltpu.PrefetchScalarGridSpec(
            num_scalar_prefetch=0,
            grid=(nb, n_layers),
            in_specs=[
                pl.BlockSpec((m_blk, kp), lambda b, l: (b, 0)),        # x (resident)
                pl.BlockSpec((1, kp, np_), lambda b, l: (l, 0, 0)),    # W' (streamed)
                pl.BlockSpec((1, 1, np_), lambda b, l: (l, 0, 0)),     # shift'
            ],
            out_specs=pl.BlockSpec((m_blk, np_), lambda b, l: (b, 0)),
            scratch_shapes=[pltpu.VMEM((m_blk, np_), jnp.float32)],
        ),
        compiler_params=pltpu.CompilerParams(
            dimension_semantics=("parallel", "arbitrary"),
            vmem_limit_bytes=vmem_limit,
        ),
        cost_estimate=cost,
    )(x_pad, w_slab, s_slab)


# ----------------------------- Parameter setup ------------------------------

def init_decoder_params(key, latent_dim, layer_dims, output_dim, eps=1e-5):
    """Deterministic synthetic init mirroring the PyTorch module's shapes.

    Weights are stored transposed vs. PyTorch, i.e. (in_features, out_features),
    so everything computes x @ W.
    """
    reversed_dims = [latent_dim] + layer_dims[::-1] + [output_dim]
    params = {"blocks": [], "head": None, "eps": eps, "dims": reversed_dims}

    for i in range(len(reversed_dims) - 2):
        fin, fout = reversed_dims[i], reversed_dims[i + 1]
        key, kw, kb, kg, kbe, krm, krv = jax.random.split(key, 7)
        bound = 1.0 / jnp.sqrt(fin)
        w = jax.random.uniform(kw, (fin, fout), jnp.float32, -bound, bound)
        b = jax.random.uniform(kb, (fout,), jnp.float32, -bound, bound)
        gamma = 1.0 + 0.1 * jax.random.normal(kg, (fout,), jnp.float32)
        beta = 0.1 * jax.random.normal(kbe, (fout,), jnp.float32)
        mean = 0.1 * jax.random.normal(krm, (fout,), jnp.float32)
        var = jnp.abs(1.0 + 0.1 * jax.random.normal(krv, (fout,), jnp.float32))
        params["blocks"].append(dict(w=w, b=b, gamma=gamma, beta=beta,
                                     mean=mean, var=var))

    fin, fout = reversed_dims[-2], reversed_dims[-1]
    key, kw, kb = jax.random.split(key, 3)
    bound = 1.0 / jnp.sqrt(fin)
    w = jax.random.uniform(kw, (fin, fout), jnp.float32, -bound, bound)
    b = jax.random.uniform(kb, (fout,), jnp.float32, -bound, bound)
    params["head"] = dict(w=w, b=b)
    return params


def fold_and_pack_params(params, weight_dtype=jnp.float32):
    """Fold Linear bias + BN(running stats) into (W', shift') and pack layers
    into a weight slab (L, Kp, Np) and a shift slab (L, 1, Np).

    Kp pads only the contraction (fin) dim to a multiple of 16; Np pads the
    output/lane dim to 128.  Padded rows/cols/shifts are exactly zero (also in
    bf16), so padded lanes stay zero through every ReLU layer.
    """
    eps = params["eps"]
    dims = params["dims"]
    n_pad = _round_up(max(dims), _LANE)                 # output / lane dim
    k_pad = _round_up(max(dims[:-1]), _KPAD_ALIGN)      # contraction dim only

    folded = []
    for blk in params["blocks"]:
        scale = blk["gamma"] / jnp.sqrt(blk["var"] + eps)           # (fout,)
        w_eff = blk["w"] * scale[None, :]                           # (fin, fout)
        shift = blk["b"] * scale + (blk["beta"] - blk["mean"] * scale)
        folded.append((w_eff, shift))
    folded.append((params["head"]["w"], params["head"]["b"]))       # no BN/ReLU

    n_layers = len(folded)
    w_slab = jnp.zeros((n_layers, k_pad, n_pad), jnp.float32)
    s_slab = jnp.zeros((n_layers, 1, n_pad), jnp.float32)
    for i, (w, s) in enumerate(folded):
        fin, fout = w.shape
        w_slab = w_slab.at[i, :fin, :fout].set(w)
        s_slab = s_slab.at[i, 0, :fout].set(s)
    return w_slab.astype(weight_dtype), s_slab


# ------------------------------- Forward pass --------------------------------

@functools.partial(jax.jit, static_argnames=("output_dim",))
def decoder_forward(x, w_slab, s_slab, *, output_dim):
    b, fin = x.shape
    _, k_pad, _ = w_slab.shape
    if b <= _MAX_BATCH_BLOCK:
        m_blk = _round_up(b, _SUBLANE)
        bp = m_blk
    else:
        m_blk = _MAX_BATCH_BLOCK
        bp = _round_up(b, _MAX_BATCH_BLOCK)
    # Tiny zero-extend of x to (bp, k_pad); fused into this jit (K-pad only, not 128).
    # TODO(synk): pass x unpadded and zero-extend inside the kernel to drop this op.
    x_pad = jnp.zeros((bp, k_pad), jnp.float32).at[:b, :fin].set(x)
    out_pad = _fused_pallas_call(x_pad, w_slab, s_slab, m_blk=m_blk)
    return out_pad[:b, :output_dim]


def decoder_forward_ref(x, params):
    """Pure-JAX reference (unfolded Linear + BN(running stats) + ReLU)."""
    eps = params["eps"]
    h = x
    for blk in params["blocks"]:
        y = h @ blk["w"] + blk["b"]
        y = (y - blk["mean"]) / jnp.sqrt(blk["var"] + eps) * blk["gamma"] + blk["beta"]
        h = jnp.maximum(y, 0.0)
    return h @ params["head"]["w"] + params["head"]["b"]


# ----------------------------------- Main ------------------------------------

if __name__ == "__main__":
    latent_dim = 8
    layer_dims = [32, 16]      # Decoder reverses these -> [8, 16, 32, output_dim]
    output_dim = 12
    batch = 8

    key = jax.random.PRNGKey(0)
    key, kx = jax.random.split(key)
    x = jax.random.normal(kx, (batch, latent_dim), jnp.float32)

    params = init_decoder_params(key, latent_dim, layer_dims, output_dim)
    ref = decoder_forward_ref(x, params)

    # f32 weights: strict check against the unfolded reference.
    w_f32, s_f32 = fold_and_pack_params(params, weight_dtype=jnp.float32)
    out_f32 = jax.block_until_ready(
        decoder_forward(x, w_f32, s_f32, output_dim=output_dim))
    assert out_f32.shape == (batch, output_dim)
    assert jnp.allclose(out_f32, ref, atol=1e-5, rtol=1e-4), \
        "Pallas f32 output mismatch vs reference"

    # bf16 weights (native MXU rate on v6e/v7x), f32 accumulation: looser check.
    w_bf16, s_bf16 = fold_and_pack_params(params, weight_dtype=jnp.bfloat16)
    out_bf16 = jax.block_until_ready(
        decoder_forward(x, w_bf16, s_bf16, output_dim=output_dim))
    assert out_bf16.shape == (batch, output_dim)
    assert jnp.allclose(out_bf16, ref, atol=5e-2, rtol=5e-2), \
        "Pallas bf16 output mismatch vs reference"

    print("KERNEL_OK")
</pallas_src>

<mosaic_0001>
module attributes {stable_mosaic.version = 11 : i64} {
  func.func @_decoder_layer_kernel(%arg0: i32, %arg1: i32, %arg2: memref<8x32xf32, #tpu.memory_space<vmem>>, %arg3: memref<1x32x128xf32, #tpu.memory_space<vmem>>, %arg4: memref<1x1x128xf32, #tpu.memory_space<vmem>>, %arg5: memref<8x128xf32, #tpu.memory_space<vmem>>, %arg6: memref<8x128xf32, #tpu.memory_space<vmem>>) attributes {dimension_semantics = [#tpu.dimension_semantics<parallel>, #tpu.dimension_semantics<arbitrary>], iteration_bounds = array<i64: 1, 3>, scalar_prefetch = 0 : i64, scratch_operands = 1 : i64, tpu.core_type = #tpu.core_type<tc>, window_params = [{transform_indices = @transform_0, window_bounds = array<i64: 8, 32>}, {transform_indices = @transform_1, window_bounds = array<i64: 1, 32, 128>}, {transform_indices = @transform_2, window_bounds = array<i64: 1, 1, 128>}, {transform_indices = @transform_3, window_bounds = array<i64: 8, 128>}]} {
    %c0 = arith.constant 0 : index
    %c0_0 = arith.constant 0 : index
    %c0_1 = arith.constant 0 : index
    %0 = vector.load %arg3[%c0, %c0_0, %c0_1] : memref<1x32x128xf32, #tpu.memory_space<vmem>>, vector<1x32x128xf32>
    %1 = vector.shape_cast %0 : vector<1x32x128xf32> to vector<32x128xf32>
    %c0_2 = arith.constant 0 : index
    %c0_3 = arith.constant 0 : index
    %c0_4 = arith.constant 0 : index
    %2 = vector.load %arg4[%c0_2, %c0_3, %c0_4] : memref<1x1x128xf32, #tpu.memory_space<vmem>>, vector<1x1x128xf32>
    %3 = vector.shape_cast %2 : vector<1x1x128xf32> to vector<1x128xf32>
    %c0_i32 = arith.constant 0 : i32
    %4 = arith.cmpi eq, %arg1, %c0_i32 : i32
    %5 = arith.extui %4 : i1 to i32
    %c0_i32_5 = arith.constant 0 : i32
    %6 = arith.cmpi ne, %5, %c0_i32_5 : i32
    scf.if %6 {
      %c0_8 = arith.constant 0 : index
      %c0_9 = arith.constant 0 : index
      %10 = vector.load %arg2[%c0_8, %c0_9] : memref<8x32xf32, #tpu.memory_space<vmem>>, vector<8x32xf32>
      %cst = arith.constant dense<0.000000e+00> : vector<8x128xf32>
      %11 = tpu.matmul %10, %1, %cst {dimension_numbers = #tpu.dot_dimension_numbers<[1], [0], [0], [1], [0, 0, 1, 1], [], []>} : vector<8x32xf32>, vector<32x128xf32>, vector<8x128xf32> -> vector<8x128xf32>
      %12 = vector.broadcast %3 : vector<1x128xf32> to vector<8x128xf32>
      %13 = arith.addf %11, %12 : vector<8x128xf32>
      %c2_i32 = arith.constant 2 : i32
      %14 = arith.cmpi slt, %arg1, %c2_i32 : i32
      %15 = arith.extui %14 : i1 to i32
      %c0_i32_10 = arith.constant 0 : i32
      %16 = arith.cmpi ne, %15, %c0_i32_10 : i32
      scf.if %16 {
        %cst_13 = arith.constant 0.000000e+00 : f32
        %20 = vector.broadcast %cst_13 : f32 to vector<8x128xf32>
        %21 = arith.maximumf %13, %20 : vector<8x128xf32>
        %c0_14 = arith.constant 0 : index
        %c0_15 = arith.constant 0 : index
        %22 = vector.load %arg6[%c0_14, %c0_15] : memref<8x128xf32, #tpu.memory_space<vmem>>, vector<8x128xf32>
        tpu.vector_store %arg6[%c0_14, %c0_15], %21 {strides = array<i32>} : memref<8x128xf32, #tpu.memory_space<vmem>>, vector<8x128xf32>,
      } else {
      }
      %c2_i32_11 = arith.constant 2 : i32
      %17 = arith.cmpi eq, %arg1, %c2_i32_11 : i32
      %18 = arith.extui %17 : i1 to i32
      %c0_i32_12 = arith.constant 0 : i32
      %19 = arith.cmpi ne, %18, %c0_i32_12 : i32
      scf.if %19 {
        %c0_13 = arith.constant 0 : index
        %c0_14 = arith.constant 0 : index
        %20 = vector.load %arg5[%c0_13, %c0_14] : memref<8x128xf32, #tpu.memory_space<vmem>>, vector<8x128xf32>
        tpu.vector_store %arg5[%c0_13, %c0_14], %13 {strides = array<i32>} : memref<8x128xf32, #tpu.memory_space<vmem>>, vector<8x128xf32>,
      } else {
      }
    } else {
    }
    %c0_i32_6 = arith.constant 0 : i32
    %7 = arith.cmpi sgt, %arg1, %c0_i32_6 : i32
    %8 = arith.extui %7 : i1 to i32
    %c0_i32_7 = arith.constant 0 : i32
    %9 = arith.cmpi ne, %8, %c0_i32_7 : i32
    scf.if %9 {
      %c0_8 = arith.constant 0 : index
      %c0_9 = arith.constant 0 : index
      %10 = vector.load %arg6[%c0_8, %c0_9] : memref<8x128xf32, #tpu.memory_space<vmem>>, vector<8x32xf32>
      %cst = arith.constant dense<0.000000e+00> : vector<8x128xf32>
      %11 = tpu.matmul %10, %1, %cst {dimension_numbers = #tpu.dot_dimension_numbers<[1], [0], [0], [1], [0, 0, 1, 1], [], []>} : vector<8x32xf32>, vector<32x128xf32>, vector<8x128xf32> -> vector<8x128xf32>
      %12 = vector.broadcast %3 : vector<1x128xf32> to vector<8x128xf32>
      %13 = arith.addf %11, %12 : vector<8x128xf32>
      %c2_i32 = arith.constant 2 : i32
      %14 = arith.cmpi slt, %arg1, %c2_i32 : i32
      %15 = arith.extui %14 : i1 to i32
      %c0_i32_10 = arith.constant 0 : i32
      %16 = arith.cmpi ne, %15, %c0_i32_10 : i32
      scf.if %16 {
        %cst_13 = arith.constant 0.000000e+00 : f32
        %20 = vector.broadcast %cst_13 : f32 to vector<8x128xf32>
        %21 = arith.maximumf %13, %20 : vector<8x128xf32>
        %c0_14 = arith.constant 0 : index
        %c0_15 = arith.constant 0 : index
        %22 = vector.load %arg6[%c0_14, %c0_15] : memref<8x128xf32, #tpu.memory_space<vmem>>, vector<8x128xf32>
        tpu.vector_store %arg6[%c0_14, %c0_15], %21 {strides = array<i32>} : memref<8x128xf32, #tpu.memory_space<vmem>>, vector<8x128xf32>,
      } else {
      }
      %c2_i32_11 = arith.constant 2 : i32
      %17 = arith.cmpi eq, %arg1, %c2_i32_11 : i32
      %18 = arith.extui %17 : i1 to i32
      %c0_i32_12 = arith.constant 0 : i32
      %19 = arith.cmpi ne, %18, %c0_i32_12 : i32
      scf.if %19 {
        %c0_13 = arith.constant 0 : index
        %c0_14 = arith.constant 0 : index
        %20 = vector.load %arg5[%c0_13, %c0_14] : memref<8x128xf32, #tpu.memory_space<vmem>>, vector<8x128xf32>
        tpu.vector_store %arg5[%c0_13, %c0_14], %13 {strides = array<i32>} : memref<8x128xf32, #tpu.memory_space<vmem>>, vector<8x128xf32>,
      } else {
      }
    } else {
    }
    return
  }
  func.func @transform_0(%arg0: i32, %arg1: i32) -> (i32, i32) {
    %c0_i32 = arith.constant 0 : i32
    %c0_i32_0 = arith.constant 0 : i32
    return %arg0, %c0_i32 : i32, i32
  }
  func.func @transform_1(%arg0: i32, %arg1: i32) -> (i32, i32, i32) {
    %c0_i32 = arith.constant 0 : i32
    %c0_i32_0 = arith.constant 0 : i32
    %c0_i32_1 = arith.constant 0 : i32
    return %arg1, %c0_i32, %c0_i32_0 : i32, i32, i32
  }
  func.func @transform_2(%arg0: i32, %arg1: i32) -> (i32, i32, i32) {
    %c0_i32 = arith.constant 0 : i32
    %c0_i32_0 = arith.constant 0 : i32
    %c0_i32_1 = arith.constant 0 : i32
    return %arg1, %c0_i32, %c0_i32_0 : i32, i32, i32
  }
  func.func @transform_3(%arg0: i32, %arg1: i32) -> (i32, i32) {
    %c0_i32 = arith.constant 0 : i32
    %c0_i32_0 = arith.constant 0 : i32
    return %arg0, %c0_i32 : i32, i32
  }
}

</mosaic_0001>

<bundles_post_ra>
// kernel: decoder_forward.1
= control target key start
LH: loop header
LB: loop body
LE: loop exit
PB: predicated region body
PF: predicated region fallthrough
CT: control target
= control target key end

     0   :  { %8 = vsyncpa [#allocation4], 0  ;;  %s741_s0 = inlined_call_operand.vmem [shape: f32[8,32], index: 0, kind: input, shape index: {}]   ;;  %s742_s1 = inlined_call_operand.hbm [shape: f32[3,32,128], index: 1, kind: input, shape index: {}]   ;;  %s743_s2 = inlined_call_operand.vmem [shape: f32[3,1,128], index: 2, kind: input, shape index: {}]   ;;  %s744_s3 = inlined_call_operand.hbm [shape: f32[8,128], index: 3, kind: output, shape index: {}]  }
   0x1   :  { %10 = vsyncpa [#allocation4 + $0x1], 0 }
   0x2   :  { %11 = vsyncpa [#allocation5], 0  ;;  %s637_s12 = smov 0   ;;  %s639_s13 = smov 0  }
   0x3   :  { %s641_s14 = smov 0   ;;  %s643_s15 = smov 0  }
   0x4   :  { %s645_s16 = smov 0   ;;  %s647_s17 = smov 0  }
   0x5 LB: > { %s414_s18 = sadd.s32 4294967295, %s612_s17   ;;  %s26_s19 = sadd.s32 1, %s608_s16  ;;  %s612_s17 = sphi %s647_s17, %s17_s17   ;;  %s608_s16 = sphi %s645_s16, %s751_s16   ;;  %s604_s15 = sphi %s643_s15, %s750_s15   ;;  %s600_s14 = sphi %s641_s14, %s749_s14   ;;  %s596_s13 = sphi %s639_s13, %s748_s13   ;;  %s592_s12 = sphi %s637_s12, %s747_s12  }
   0x6   : > { %p27_p0 = scmp.ge.s32.totalorder %s26_s19, 3  ;;  %s62_s20 = sadd.s32 1, %s600_s14 }
   0x7   : > { %p69_p1 = scmp.ne.s32.totalorder %s600_s14, %s596_s13  ;;  %p70_p2 = scmp.eq.s32.totalorder %s612_s17, 0 }
   0x8   : > { %s753_s19 = smov (%p27_p0, %s26_s19), 0  ;;  %p75_p4 = scmp.ne.s32.totalorder %s596_s13, %s592_s12 }
   0x9   : > { %p673_p3 = por %p70_p2, %p69_p1  ;;  %s59_s22 = ssub.s32 %s608_s16, %s753_s19 }
   0xa   : > { %p76_p5 = scmp.eq.s32.totalorder %s414_s18, 0  ;;  %p60_p6 = scmp.eq.s32.totalorder %s59_s22, 0 }
   0xb   : > { %p446_p8 = scmp.lt.s32.totalorder %s612_s17, 3  ;;  %s158_s25 = sand.u32 1, %s600_s14  }
   0xc   : > { %p682_p7 = por %p76_p5, %p75_p4  ;;  %s435_s26 = sshll.u32 %s608_s16, 5 }
   0xd   : > { %s688_s24 = scalar_select %p60_p6, %s600_s14, %s62_s20  }
   0xe   : > { %s418_s27 = sshll.u32 %s158_s25, 5  ;;  %s167_s30 = scalar_lea.hbm %s742_s1, %s435_s26 }
   0xf   : > { %s168_s4 = sshll.u32 %s167_s30, 4  ;;  %s162_s5 = scalar_lea.vmem [#allocation3], %s418_s27  ;;  %s169_s4 = int_to_ptr.hbm [resolvable:$true] %s168_s4 }
  0x10   : > { %s170_s6 = sshll.u32 %s162_s5, 4  ;;  %p443_p9 = pnand %p446_p8, %p673_p3  ;;  %s171_s6 = int_to_ptr.vmem [resolvable:$true] %s170_s6 }
  0x11   : > { %p421_p10 = scmp.ge.s32.totalorder %s612_s17, 1  ;;  %p184_p11 = scmp.lt.s32.totalorder %s612_s17, 4 }
  0x12   : > { %s159_s7 = scalar_lea.sflag [#allocation4], %s158_s25  ;;  %s614_s8 = smov 128  }
  0x13   : > { %s615_s9 = smov 8   ;;  %p185_p12 = pnand %p421_p10, %p184_p11 }
  0x14   : > { %445 = dma.hbm_to_vmem [thread:$0]  (!%p443_p9), %s169_s4, 512, %s171_s6, %s159_s7, %s614_s8, %s614_s8, %s615_s9  }
  0x15   : > { %188 = sbr.rel (%p185_p12) target bundleno = 340 (0x154), region = 32  ;;  %s190_s10 = sand.u32 (!%p185_p12), 1, %s596_s13  }
  0x16   : > { %s422_s11 = sshll.u32 (!%p185_p12), %s190_s10, 5  ;;  %s191_s12 = scalar_lea.sflag (!%p185_p12), [#allocation4], %s190_s10 }
  0x17   : > { %s194_s20 = scalar_lea.vmem (!%p185_p12), [#allocation3], %s422_s11 }
  0x1a   : > { %583 = dma.done.wait (%p682_p7), %s191_s12, 512  }
  0x1b   : > { %585 = vsyncadd (%p682_p7), %s191_s12, 4294966784  ;;  %p224_p13 = scmp.lt.s32.totalorder %s604_s15, 2  ;;  %v227_v0 = vld [vmem:[%s194_s20] sm:$0xff]  ;;  %v228_v1 = vld [vmem:[%s194_s20 + $0x8] sm:$0xff]  ;;  %p423_p0 = scmp.ne.s32.totalorder %s604_s15, 0 }
  0x1c   : > { %v229_v2 = vld [vmem:[%s194_s20 + $0x10] sm:$0xff]  ;;  %v230_v3 = vld [vmem:[%s194_s20 + $0x18] sm:$0xff]  ;;  %p425_p1 = scmp.ge.s32.totalorder (!%p423_p0), %s604_s15, 2 }
  0x1d   : > { %s225_s21 = scalar_select %p224_p13, %s604_s15, 2 }
  0x1e   : > { %235 = sbr.rel (%p423_p0) target bundleno = 181 (0xb5), region = 40 }
  0x1f   : > { %s226_s26 = scalar_lea.vmem %s743_s2, %s225_s21 }
  0x20   : > { %v231_v4 = vld [vmem:[%s226_s26] sm:$0x1] }
  0x23   : > { %256 = vmatpush.msra.mxu0 %v230_v3  ;;  %v236_v5 = vld [vmem:[%s741_s0] sm:$0xff]  ;;  %vm240_vm0 = vcmask 261120   ;;  %v238_v6 = vperm.slane %v231_v4, 0 }
  0x25   : > { %257 = vmatpush.msra.mxu0 %v229_v2 }
  0x27   : > { %258 = vmatpush.msra.mxu0 %v228_v1 }
  0x29   : > { %259 = vmatpush.msra.mxu0 %v227_v0 }
  0x2a   : > { %424 = vmatmul.msk.f32.vlgmr.msra.gmra.mxu0 %vm240_vm0, %v236_v5 }
  0xa4   : > { %267 = sbr.rel (%p425_p1) target bundleno = 173 (0xad), region = 44 }
  0xa7   : > { %v261_v7 = vpop.f32.mrf.mxu0 }
  0xa8   : > { %v262_v8 = vadd.f32 %v261_v7, %v238_v6 }
  0xaa   : > { %v268_v9 = vmax.f32 %v262_v8, 0.0 }
  0xac   : > { %269 = vst [vmem:[#allocation2] sm:$0xff] %v268_v9 }
  0xad PF: > { %p426_p2 = scmp.ne.s32.totalorder %s604_s15, 2 }
  0xaf   : > { %273 = sbr.rel (%p426_p2) target bundleno = 181 (0xb5), region = 48 }
  0xb4   : > { %274 = vst [vmem:[#allocation6] sm:$0xff] %v262_v8 }
  0xb5 PF: > { %p427_p3 = scmp.le.s32.totalorder %s604_s15, 0 }
  0xb6   : > { %p429_p4 = scmp.ge.s32.totalorder (!%p427_p3), %s604_s15, 2 }
  0xb7   : > { %278 = sbr.rel (%p427_p3) target bundleno = 334 (0x14e), region = 52 }
  0xbc   : > { %299 = vmatpush.msra.mxu0 %v230_v3  ;;  %v279_v10 = vld [vmem:[#allocation2] sm:$0xff]  ;;  %vm283_vm1 = vcmask 261120   ;;  %v281_v11 = vperm.slane %v231_v4, 0 }
  0xbe   : > { %300 = vmatpush.msra.mxu0 %v229_v2 }
  0xc0   : > { %301 = vmatpush.msra.mxu0 %v228_v1 }
  0xc2   : > { %302 = vmatpush.msra.mxu0 %v227_v0 }
  0xc3   : > { %428 = vmatmul.msk.f32.vlgmr.msra.gmra.mxu0 %vm283_vm1, %v279_v10 }
 0x13d   : > { %310 = sbr.rel (%p429_p4) target bundleno = 326 (0x146), region = 56 }
 0x140   : > { %v304_v12 = vpop.f32.mrf.mxu0 }
 0x141   : > { %v305_v13 = vadd.f32 %v304_v12, %v281_v11 }
 0x143   : > { %v311_v14 = vmax.f32 %v305_v13, 0.0 }
 0x145   : > { %312 = vst [vmem:[#allocation2] sm:$0xff] %v311_v14 }
 0x146 PF: > { %p430_p5 = scmp.ne.s32.totalorder %s604_s15, 2 }
 0x148   : > { %316 = sbr.rel (%p430_p5) target bundleno = 334 (0x14e), region = 60 }
 0x14d   : > { %317 = vst [vmem:[#allocation6] sm:$0xff] %v305_v13 }
 0x14e PF: > { %p447_p6 = scmp.eq.s32.totalorder %s414_s18, 2  ;;  %s328_s30 = sshll.u32 %s744_s3, 4  ;;  %s329_s30 = int_to_ptr.hbm [resolvable:$true] %s328_s30 }
 0x14f   : > { %s616_s4 = smov [#allocation6]  }
 0x150   : > { %s326_s5 = sshll.u32 %s616_s4, 4  ;;  %s327_s5 = int_to_ptr.vmem [resolvable:$true] %s326_s5 }
 0x151   : > { %439 = dma.vmem_to_hbm [thread:$0]  (%p447_p6), %s327_s5, 128, %s329_s30, [#allocation5]  }
 0x152   : > { %587 = dma.done.wait (%p447_p6), [#allocation5], 128  }
 0x153   : > { %589 = vsyncadd (%p447_p6), [#allocation5], 4294967168 }
 0x154 PF: > { %s17_s17 = sadd.s32 1, %s612_s17   ;;  %s747_s12 = smov %s596_s13 }
 0x155   : > { %p14_p7 = scmp.ge.s32.totalorder %s17_s17, 5   ;;  %s748_s13 = smov %s600_s14 }
 0x156   : > { %s749_s14 = smov %s688_s24  ;;  %s750_s15 = smov %s608_s16 }
 0x157   : > { %s751_s16 = smov %s753_s19  ;;  %16 = sbr.rel (!%p14_p7) target bundleno = 5 (0x5), region = 100 }
 0x15c   :  { %342 = vsyncpa [#allocation4], 1 }
 0x15d   :  { %344 = vsyncpa [#allocation4 + $0x1], 1 }
 0x15e   :  { %345 = vsyncpa [#allocation5], 1 }
 0x15f   :  { %347 = vsyncpa [#allocation5 + $0x1], 1 }

</bundles_post_ra>
